<compile_context>
chip_gen: v7x
topology: tpu7x:2x2x1
jax: 0.10.0
libtpu: 0.0.40
codegen_flags: <defaults>
</compile_context>

<pallas_src>
import jax
import jax.numpy as jnp
from jax.experimental import pallas as pl
from jax.experimental.pallas import tpu as pltpu


def _round_up(x, m):
    return ((x + m - 1) // m) * m


def _fused_gather_mlp_kernel(src_ref, dst_ref, zi_t_ref, zj_t_ref,
                             w1s_ref, w1d_ref, b1_ref,
                             w2_ref, b2_ref, w3_ref, b3_ref, out_ref):
    """One edge tile: gather (one-hot matmul) + 3-layer MLP, edges on lanes."""
    n_nodes = zi_t_ref.shape[1]
    tile_e = src_ref.shape[1]
    cdt = zi_t_ref.dtype                                   # bf16 compute dtype

    src = src_ref[...]                                     # (1, TILE_E) int32
    dst = dst_ref[...]

    # One-hot gather matrices (num_nodes, TILE_E) — MXU-friendly gather.
    node_ids = jax.lax.broadcasted_iota(jnp.int32, (n_nodes, tile_e), 0)
    oh_src = (jnp.broadcast_to(src, (n_nodes, tile_e)) == node_ids).astype(cdt)
    oh_dst = (jnp.broadcast_to(dst, (n_nodes, tile_e)) == node_ids).astype(cdt)

    hi = jnp.dot(zi_t_ref[...], oh_src,
                 preferred_element_type=jnp.float32)       # (D, TILE_E)
    hj = jnp.dot(zj_t_ref[...], oh_dst,
                 preferred_element_type=jnp.float32)       # (D, TILE_E)

    # Layer 1: split-W1 so concat([hi, hj]) is never materialized.
    h = (jnp.dot(w1s_ref[...], hi.astype(cdt), preferred_element_type=jnp.float32)
         + jnp.dot(w1d_ref[...], hj.astype(cdt), preferred_element_type=jnp.float32)
         + b1_ref[...])
    h = jnp.maximum(h, 0.0)                                # (hid1, TILE_E) f32

    # Layer 2
    h = jnp.dot(w2_ref[...], h.astype(cdt),
                preferred_element_type=jnp.float32) + b2_ref[...]
    h = jnp.maximum(h, 0.0)                                # (hid2, TILE_E) f32

    # Layer 3 + sigmoid (tanh form -> EUP slot, numerically robust)
    s = jnp.dot(w3_ref[...], h.astype(cdt),
                preferred_element_type=jnp.float32) + b3_ref[...]
    out_ref[...] = 0.5 * (jnp.tanh(0.5 * s) + 1.0)         # (1, TILE_E) f32


def graph_nc_forward(zi, zj, src_idx, dst_idx, params, *,
                     tile_e=2048, compute_dtype=jnp.bfloat16):
    """GraphNC.forward: per-edge src/dst gather + LR_Classification MLP, fused."""
    E = int(src_idx.shape[0])
    num_nodes, D = zi.shape
    hid1 = params["w1"].shape[1]
    hid2 = params["w2"].shape[1]
    in_feats = 2 * D

    # Tile over the edge axis (lane axis). Keep tiles >=128 and a multiple of 128.
    tile_e = min(tile_e, _round_up(max(E, 1), 128))
    e_pad = _round_up(max(E, 1), tile_e)
    grid = (e_pad // tile_e,)

    # Pad edge indices to the tiled length (tail lanes gather node 0; sliced off).
    src_p = jnp.zeros((1, e_pad), jnp.int32).at[0, :E].set(src_idx.astype(jnp.int32))
    dst_p = jnp.zeros((1, e_pad), jnp.int32).at[0, :E].set(dst_idx.astype(jnp.int32))

    # Transposed (feature-major) layouts; matmul operands in bf16.
    zi_t = zi.T.astype(compute_dtype)                      # (D, N)
    zj_t = zj.T.astype(compute_dtype)                      # (D, N)
    w1_t = params["w1"].T                                  # (hid1, 2D)
    w1s = w1_t[:, :D].astype(compute_dtype)                # (hid1, D)  src half
    w1d = w1_t[:, D:].astype(compute_dtype)                # (hid1, D)  dst half
    b1 = params["b1"].reshape(hid1, 1).astype(jnp.float32)
    w2_t = params["w2"].T.astype(compute_dtype)            # (hid2, hid1)
    b2 = params["b2"].reshape(hid2, 1).astype(jnp.float32)
    w3_t = params["w3"].T.astype(compute_dtype)            # (1, hid2)
    b3 = params["b3"].reshape(1, 1).astype(jnp.float32)

    idx_spec = pl.BlockSpec((1, tile_e), lambda i: (0, i))

    def const(arr):
        # Full-array, VMEM-resident block (constant index map -> no re-DMA).
        return pl.BlockSpec(arr.shape, lambda i: (0, 0))

    cost = pl.CostEstimate(
        flops=2 * e_pad * (2 * D * num_nodes + in_feats * hid1 + hid1 * hid2 + hid2),
        transcendentals=e_pad,
        bytes_accessed=int(
            2 * 4 * e_pad                      # src/dst indices
            + 4 * e_pad                        # f32 scores out
            + (zi_t.size + zj_t.size) * 2      # bf16 embeddings
            + (w1s.size + w1d.size + w2_t.size + w3_t.size) * 2
            + (b1.size + b2.size + b3.size) * 4),
    )

    out = pl.pallas_call(
        _fused_gather_mlp_kernel,
        out_shape=jax.ShapeDtypeStruct((1, e_pad), jnp.float32),
        grid=grid,
        in_specs=[
            idx_spec, idx_spec,
            const(zi_t), const(zj_t),
            const(w1s), const(w1d), const(b1),
            const(w2_t), const(b2),
            const(w3_t), const(b3),
        ],
        out_specs=pl.BlockSpec((1, tile_e), lambda i: (0, i)),
        compiler_params=pltpu.CompilerParams(
            dimension_semantics=("parallel",)),   # shard edge tiles across v7x TCs
        cost_estimate=cost,
    )(src_p, dst_p, zi_t, zj_t, w1s, w1d, b1, w2_t, b2, w3_t, b3)

    # Back to the PyTorch layout: (E, 1) edge scores.
    return out[0, :E].reshape(E, 1)


def init_params(key, in_feats, hid1, hid2):
    """Deterministic synthetic parameters (same shapes as the PyTorch module)."""
    ks = jax.random.split(key, 6)

    def uni(k, shape, fan_in):
        bound = 1.0 / jnp.sqrt(fan_in)
        return jax.random.uniform(k, shape, jnp.float32, -bound, bound)

    return {
        # stored (fan_in, fan_out); biases as (1, fan_out) rows
        "w1": uni(ks[0], (in_feats, hid1), in_feats),
        "b1": uni(ks[1], (1, hid1), in_feats),
        "w2": uni(ks[2], (hid1, hid2), hid1),
        "b2": uni(ks[3], (1, hid2), hid1),
        "w3": uni(ks[4], (hid2, 1), hid2),
        "b3": uni(ks[5], (1, 1), hid2),
    }


if __name__ == "__main__":
    key = jax.random.PRNGKey(0)
    k_zi, k_zj, k_src, k_dst, k_param = jax.random.split(key, 5)

    # small shapes: node embedding dim D=16 -> in_feats = 2*D = 32
    num_nodes, D = 8, 16
    num_edges = 16
    in_feats, hid1, hid2 = 2 * D, 32, 16

    zi = jax.random.normal(k_zi, (num_nodes, D), jnp.float32)   # srcdata['z']
    zj = jax.random.normal(k_zj, (num_nodes, D), jnp.float32)   # dstdata['z']
    src_idx = jax.random.randint(k_src, (num_edges,), 0, num_nodes)
    dst_idx = jax.random.randint(k_dst, (num_edges,), 0, num_nodes)

    params = init_params(k_param, in_feats, hid1, hid2)

    pos_score = graph_nc_forward(zi, zj, src_idx, dst_idx, params)
    pos_score = jax.block_until_ready(pos_score)

    # sanity: f32 reference in plain JAX (kernel matmuls run bf16 w/ f32 accum)
    raw = jnp.concatenate([zi[src_idx], zj[dst_idx]], axis=1)
    h = jnp.maximum(raw @ params["w1"] + params["b1"], 0.0)
    h = jnp.maximum(h @ params["w2"] + params["b2"], 0.0)
    ref = jax.nn.sigmoid(h @ params["w3"] + params["b3"])

    assert pos_score.shape == (num_edges, 1)
    assert jnp.allclose(pos_score, ref, atol=2e-2, rtol=2e-2), \
        float(jnp.max(jnp.abs(pos_score - ref)))

    print("KERNEL_OK")
</pallas_src>

<mosaic_0001>
module attributes {stable_mosaic.version = 11 : i64} {
  func.func @_fused_gather_mlp_kernel(%arg0: i32, %arg1: memref<1x128xi32, #tpu.memory_space<vmem>>, %arg2: memref<1x128xi32, #tpu.memory_space<vmem>>, %arg3: memref<16x8xbf16, #tpu.memory_space<vmem>>, %arg4: memref<16x8xbf16, #tpu.memory_space<vmem>>, %arg5: memref<32x16xbf16, #tpu.memory_space<vmem>>, %arg6: memref<32x16xbf16, #tpu.memory_space<vmem>>, %arg7: memref<32x1xf32, #tpu.memory_space<vmem>>, %arg8: memref<16x32xbf16, #tpu.memory_space<vmem>>, %arg9: memref<16x1xf32, #tpu.memory_space<vmem>>, %arg10: memref<1x16xbf16, #tpu.memory_space<vmem>>, %arg11: memref<1x1xf32, #tpu.memory_space<vmem>>, %arg12: memref<1x128xf32, #tpu.memory_space<vmem>>) attributes {dimension_semantics = [#tpu.dimension_semantics<parallel>], iteration_bounds = array<i64: 1>, scalar_prefetch = 0 : i64, scratch_operands = 0 : i64, tpu.core_type = #tpu.core_type<tc>, window_params = [{transform_indices = @transform_0, window_bounds = array<i64: 1, 128>}, {transform_indices = @transform_1, window_bounds = array<i64: 1, 128>}, {pipeline_mode = #tpu.pipeline_mode<synchronous>, transform_indices = @transform_2, window_bounds = array<i64: 16, 8>}, {pipeline_mode = #tpu.pipeline_mode<synchronous>, transform_indices = @transform_3, window_bounds = array<i64: 16, 8>}, {pipeline_mode = #tpu.pipeline_mode<synchronous>, transform_indices = @transform_4, window_bounds = array<i64: 32, 16>}, {pipeline_mode = #tpu.pipeline_mode<synchronous>, transform_indices = @transform_5, window_bounds = array<i64: 32, 16>}, {pipeline_mode = #tpu.pipeline_mode<synchronous>, transform_indices = @transform_6, window_bounds = array<i64: 32, 1>}, {pipeline_mode = #tpu.pipeline_mode<synchronous>, transform_indices = @transform_7, window_bounds = array<i64: 16, 32>}, {pipeline_mode = #tpu.pipeline_mode<synchronous>, transform_indices = @transform_8, window_bounds = array<i64: 16, 1>}, {pipeline_mode = #tpu.pipeline_mode<synchronous>, transform_indices = @transform_9, window_bounds = array<i64: 1, 16>}, {pipeline_mode = #tpu.pipeline_mode<synchronous>, transform_indices = @transform_10, window_bounds = array<i64: 1, 1>}, {transform_indices = @transform_11, window_bounds = array<i64: 1, 128>}]} {
    %c0 = arith.constant 0 : index
    %c0_0 = arith.constant 0 : index
    %0 = vector.load %arg1[%c0, %c0_0] : memref<1x128xi32, #tpu.memory_space<vmem>>, vector<1x128xi32>
    %c0_1 = arith.constant 0 : index
    %c0_2 = arith.constant 0 : index
    %1 = vector.load %arg2[%c0_1, %c0_2] : memref<1x128xi32, #tpu.memory_space<vmem>>, vector<1x128xi32>
    %2 = tpu.iota {dimensions = array<i32: 0>} : vector<8x128xi32>
    %3 = vector.shape_cast %0 : vector<1x128xi32> to vector<1x128xi32>
    %4 = vector.broadcast %3 : vector<1x128xi32> to vector<8x128xi32>
    %5 = arith.cmpi eq, %4, %2 : vector<8x128xi32>
    %6 = arith.extui %5 : vector<8x128xi1> to vector<8x128xi32>
    %7 = arith.sitofp %6 : vector<8x128xi32> to vector<8x128xf32>
    %8 = arith.truncf %7 : vector<8x128xf32> to vector<8x128xbf16>
    %9 = vector.shape_cast %1 : vector<1x128xi32> to vector<1x128xi32>
    %10 = vector.broadcast %9 : vector<1x128xi32> to vector<8x128xi32>
    %11 = arith.cmpi eq, %10, %2 : vector<8x128xi32>
    %12 = arith.extui %11 : vector<8x128xi1> to vector<8x128xi32>
    %13 = arith.sitofp %12 : vector<8x128xi32> to vector<8x128xf32>
    %14 = arith.truncf %13 : vector<8x128xf32> to vector<8x128xbf16>
    %c0_3 = arith.constant 0 : index
    %c0_4 = arith.constant 0 : index
    %15 = vector.load %arg3[%c0_3, %c0_4] : memref<16x8xbf16, #tpu.memory_space<vmem>>, vector<16x8xbf16>
    %cst = arith.constant dense<0.000000e+00> : vector<16x128xf32>
    %16 = tpu.matmul %15, %8, %cst {dimension_numbers = #tpu.dot_dimension_numbers<[1], [0], [0], [1], [0, 0, 1, 1], [], []>} : vector<16x8xbf16>, vector<8x128xbf16>, vector<16x128xf32> -> vector<16x128xf32>
    %c0_5 = arith.constant 0 : index
    %c0_6 = arith.constant 0 : index
    %17 = vector.load %arg4[%c0_5, %c0_6] : memref<16x8xbf16, #tpu.memory_space<vmem>>, vector<16x8xbf16>
    %cst_7 = arith.constant dense<0.000000e+00> : vector<16x128xf32>
    %18 = tpu.matmul %17, %14, %cst_7 {dimension_numbers = #tpu.dot_dimension_numbers<[1], [0], [0], [1], [0, 0, 1, 1], [], []>} : vector<16x8xbf16>, vector<8x128xbf16>, vector<16x128xf32> -> vector<16x128xf32>
    %c0_8 = arith.constant 0 : index
    %c0_9 = arith.constant 0 : index
    %19 = vector.load %arg5[%c0_8, %c0_9] : memref<32x16xbf16, #tpu.memory_space<vmem>>, vector<32x16xbf16>
    %20 = arith.truncf %16 : vector<16x128xf32> to vector<16x128xbf16>
    %cst_10 = arith.constant dense<0.000000e+00> : vector<32x128xf32>
    %21 = tpu.matmul %19, %20, %cst_10 {dimension_numbers = #tpu.dot_dimension_numbers<[1], [0], [0], [1], [0, 0, 1, 1], [], []>} : vector<32x16xbf16>, vector<16x128xbf16>, vector<32x128xf32> -> vector<32x128xf32>
    %c0_11 = arith.constant 0 : index
    %c0_12 = arith.constant 0 : index
    %22 = vector.load %arg6[%c0_11, %c0_12] : memref<32x16xbf16, #tpu.memory_space<vmem>>, vector<32x16xbf16>
    %23 = arith.truncf %18 : vector<16x128xf32> to vector<16x128xbf16>
    %cst_13 = arith.constant dense<0.000000e+00> : vector<32x128xf32>
    %24 = tpu.matmul %22, %23, %cst_13 {dimension_numbers = #tpu.dot_dimension_numbers<[1], [0], [0], [1], [0, 0, 1, 1], [], []>} : vector<32x16xbf16>, vector<16x128xbf16>, vector<32x128xf32> -> vector<32x128xf32>
    %25 = arith.addf %21, %24 : vector<32x128xf32>
    %c0_14 = arith.constant 0 : index
    %c0_15 = arith.constant 0 : index
    %26 = vector.load %arg7[%c0_14, %c0_15] : memref<32x1xf32, #tpu.memory_space<vmem>>, vector<32x1xf32>
    %27 = vector.broadcast %26 : vector<32x1xf32> to vector<32x128xf32>
    %28 = arith.addf %25, %27 : vector<32x128xf32>
    %cst_16 = arith.constant 0.000000e+00 : f32
    %29 = vector.broadcast %cst_16 : f32 to vector<32x128xf32>
    %30 = arith.maximumf %28, %29 : vector<32x128xf32>
    %c0_17 = arith.constant 0 : index
    %c0_18 = arith.constant 0 : index
    %31 = vector.load %arg8[%c0_17, %c0_18] : memref<16x32xbf16, #tpu.memory_space<vmem>>, vector<16x32xbf16>
    %32 = arith.truncf %30 : vector<32x128xf32> to vector<32x128xbf16>
    %cst_19 = arith.constant dense<0.000000e+00> : vector<16x128xf32>
    %33 = tpu.matmul %31, %32, %cst_19 {dimension_numbers = #tpu.dot_dimension_numbers<[1], [0], [0], [1], [0, 0, 1, 1], [], []>} : vector<16x32xbf16>, vector<32x128xbf16>, vector<16x128xf32> -> vector<16x128xf32>
    %c0_20 = arith.constant 0 : index
    %c0_21 = arith.constant 0 : index
    %34 = vector.load %arg9[%c0_20, %c0_21] : memref<16x1xf32, #tpu.memory_space<vmem>>, vector<16x1xf32>
    %35 = vector.broadcast %34 : vector<16x1xf32> to vector<16x128xf32>
    %36 = arith.addf %33, %35 : vector<16x128xf32>
    %cst_22 = arith.constant 0.000000e+00 : f32
    %37 = vector.broadcast %cst_22 : f32 to vector<16x128xf32>
    %38 = arith.maximumf %36, %37 : vector<16x128xf32>
    %c0_23 = arith.constant 0 : index
    %c0_24 = arith.constant 0 : index
    %39 = vector.load %arg10[%c0_23, %c0_24] : memref<1x16xbf16, #tpu.memory_space<vmem>>, vector<1x16xbf16>
    %40 = arith.truncf %38 : vector<16x128xf32> to vector<16x128xbf16>
    %cst_25 = arith.constant dense<0.000000e+00> : vector<1x128xf32>
    %41 = tpu.matmul %39, %40, %cst_25 {dimension_numbers = #tpu.dot_dimension_numbers<[1], [0], [0], [1], [0, 0, 1, 1], [], []>} : vector<1x16xbf16>, vector<16x128xbf16>, vector<1x128xf32> -> vector<1x128xf32>
    %c0_26 = arith.constant 0 : index
    %c0_27 = arith.constant 0 : index
    %42 = vector.load %arg11[%c0_26, %c0_27] : memref<1x1xf32, #tpu.memory_space<vmem>>, vector<1x1xf32>
    %43 = vector.broadcast %42 : vector<1x1xf32> to vector<1x128xf32>
    %44 = arith.addf %41, %43 : vector<1x128xf32>
    %cst_28 = arith.constant 5.000000e-01 : f32
    %45 = vector.broadcast %cst_28 : f32 to vector<1x128xf32>
    %46 = arith.mulf %45, %44 : vector<1x128xf32>
    %47 = math.tanh %46 : vector<1x128xf32>
    %cst_29 = arith.constant 1.000000e+00 : f32
    %48 = vector.broadcast %cst_29 : f32 to vector<1x128xf32>
    %49 = arith.addf %47, %48 : vector<1x128xf32>
    %cst_30 = arith.constant 5.000000e-01 : f32
    %50 = vector.broadcast %cst_30 : f32 to vector<1x128xf32>
    %51 = arith.mulf %50, %49 : vector<1x128xf32>
    %c0_31 = arith.constant 0 : index
    %c0_32 = arith.constant 0 : index
    %52 = vector.load %arg12[%c0_31, %c0_32] : memref<1x128xf32, #tpu.memory_space<vmem>>, vector<1x128xf32>
    tpu.vector_store %arg12[%c0_31, %c0_32], %51 {strides = array<i32>} : memref<1x128xf32, #tpu.memory_space<vmem>>, vector<1x128xf32>,
    return
  }
  func.func @transform_0(%arg0: i32) -> (i32, i32) {
    %c0_i32 = arith.constant 0 : i32
    %c0_i32_0 = arith.constant 0 : i32
    return %c0_i32, %arg0 : i32, i32
  }
  func.func @transform_1(%arg0: i32) -> (i32, i32) {
    %c0_i32 = arith.constant 0 : i32
    %c0_i32_0 = arith.constant 0 : i32
    return %c0_i32, %arg0 : i32, i32
  }
  func.func @transform_2(%arg0: i32) -> (i32, i32) {
    %c0_i32 = arith.constant 0 : i32
    %c0_i32_0 = arith.constant 0 : i32
    %c0_i32_1 = arith.constant 0 : i32
    return %c0_i32, %c0_i32_0 : i32, i32
  }
  func.func @transform_3(%arg0: i32) -> (i32, i32) {
    %c0_i32 = arith.constant 0 : i32
    %c0_i32_0 = arith.constant 0 : i32
    %c0_i32_1 = arith.constant 0 : i32
    return %c0_i32, %c0_i32_0 : i32, i32
  }
  func.func @transform_4(%arg0: i32) -> (i32, i32) {
    %c0_i32 = arith.constant 0 : i32
    %c0_i32_0 = arith.constant 0 : i32
    %c0_i32_1 = arith.constant 0 : i32
    return %c0_i32, %c0_i32_0 : i32, i32
  }
  func.func @transform_5(%arg0: i32) -> (i32, i32) {
    %c0_i32 = arith.constant 0 : i32
    %c0_i32_0 = arith.constant 0 : i32
    %c0_i32_1 = arith.constant 0 : i32
    return %c0_i32, %c0_i32_0 : i32, i32
  }
  func.func @transform_6(%arg0: i32) -> (i32, i32) {
    %c0_i32 = arith.constant 0 : i32
    %c0_i32_0 = arith.constant 0 : i32
    %c0_i32_1 = arith.constant 0 : i32
    return %c0_i32, %c0_i32_0 : i32, i32
  }
  func.func @transform_7(%arg0: i32) -> (i32, i32) {
    %c0_i32 = arith.constant 0 : i32
    %c0_i32_0 = arith.constant 0 : i32
    %c0_i32_1 = arith.constant 0 : i32
    return %c0_i32, %c0_i32_0 : i32, i32
  }
  func.func @transform_8(%arg0: i32) -> (i32, i32) {
    %c0_i32 = arith.constant 0 : i32
    %c0_i32_0 = arith.constant 0 : i32
    %c0_i32_1 = arith.constant 0 : i32
    return %c0_i32, %c0_i32_0 : i32, i32
  }
  func.func @transform_9(%arg0: i32) -> (i32, i32) {
    %c0_i32 = arith.constant 0 : i32
    %c0_i32_0 = arith.constant 0 : i32
    %c0_i32_1 = arith.constant 0 : i32
    return %c0_i32, %c0_i32_0 : i32, i32
  }
  func.func @transform_10(%arg0: i32) -> (i32, i32) {
    %c0_i32 = arith.constant 0 : i32
    %c0_i32_0 = arith.constant 0 : i32
    %c0_i32_1 = arith.constant 0 : i32
    return %c0_i32, %c0_i32_0 : i32, i32
  }
  func.func @transform_11(%arg0: i32) -> (i32, i32) {
    %c0_i32 = arith.constant 0 : i32
    %c0_i32_0 = arith.constant 0 : i32
    return %c0_i32, %arg0 : i32, i32
  }
}

</mosaic_0001>

<bundles_post_ra>
// kernel: tpu_custom_call.1
= control target key start
LH: loop header
LB: loop body
LE: loop exit
PB: predicated region body
PF: predicated region fallthrough
CT: control target
= control target key end

     0   :  { %s754_s0 = inlined_call_operand.vmem [shape: s32[1,128], index: 0, kind: input, shape index: {}]   ;;  %s755_s1 = inlined_call_operand.vmem [shape: s32[1,128], index: 1, kind: input, shape index: {}]   ;;  %s756_s2 = inlined_call_operand.vmem [shape: bf16[16,8], index: 2, kind: input, shape index: {}]   ;;  %s757_s3 = inlined_call_operand.vmem [shape: bf16[16,8], index: 3, kind: input, shape index: {}]   ;;  %s758_s4 = inlined_call_operand.vmem [shape: bf16[32,16], index: 4, kind: input, shape index: {}]   ;;  %s759_s5 = inlined_call_operand.vmem [shape: bf16[32,16], index: 5, kind: input, shape index: {}]   ;;  %s760_s6 = inlined_call_operand.vmem [shape: f32[32,1], index: 6, kind: input, shape index: {}]   ;;  %s761_s7 = inlined_call_operand.vmem [shape: bf16[16,32], index: 7, kind: input, shape index: {}]   ;;  %s762_s8 = inlined_call_operand.vmem [shape: f32[16,1], index: 8, kind: input, shape index: {}]   ;;  %s763_s9 = inlined_call_operand.vmem [shape: bf16[1,16], index: 9, kind: input, shape index: {}]   ;;  %s764_s10 = inlined_call_operand.<no memory space> [shape: f32[1,1], index: 10, kind: input, shape index: {}]   ;;  %s765_s11 = inlined_call_operand.hbm [shape: f32[1,128], index: 11, kind: output, shape index: {}]  }
   0x1   :  { %v16_v0 = vstv %s764_s10 }
   0x2   :  { %17 = vst [vmem:[#allocation2] sm:$0x1] %v16_v0 }
   0x3   :  { %v44_v1 = vlaneseq  ;;  %v602_v2 = vmov 0.0   ;;  %v489_v3 = vld [vmem:[%s755_s1] ss:$0 sm:$0xff]  ;;  %vm603_vm0 = vmmov 0   ;;  %vm73_vm1 = vcmask 1043456  }
   0x4   :  { %527 = vmatprep.subr.bf16.mxu1 %v602_v2  ;;  %529 = vmatprep.mubr.msk.bf16.mxu1 %vm603_vm0, %v602_v2  ;;  %v487_v5 = vld [vmem:[%s754_s0] ss:$0 sm:$0xff] }
   0x5   :  { %v675_v4 = vshrl.u32 %v44_v1, 7  ;;  %521 = vmatprep.subr.bf16.mxu0 %v602_v2  ;;  %523 = vmatprep.mubr.msk.bf16.mxu0 %vm603_vm0, %v602_v2 }
   0x7   :  { %vm58_vm2 = vcmp.eq.s32.totalorder %v489_v3, %v675_v4  ;;  %vm50_vm3 = vcmp.eq.s32.totalorder %v487_v5, %v675_v4 }
   0x8   :  { %v490_v6 = vsel %vm58_vm2, 1.0, %v602_v2  ;;  %v488_v7 = vsel %vm50_vm3, 1.0, %v602_v2 }
   0x9   :  { %v61_v8 = vpack.c.bf16 %v490_v6, %v490_v6  ;;  %v53_v9 = vpack.c.bf16 %v488_v7, %v488_v7 }
   0xa   :  { %18 = vsyncpa [#allocation4], 0  ;;  %v569_v11 = vld [vmem:[%s757_s3] sm:$0xff]   ;;  %vm69_vm4 = vcmask 64512   ;;  %vm192_vm5 = vcmask 130048   ;;  %v315_v16 = vld [vmem:[%s760_s6 + $0x10] sm:$0xff] }
   0xb   :  { %v129_v10 = vsel %vm73_vm1, %v61_v8, 0  ;;  %v75_v12 = vsel %vm73_vm1, %v53_v9, 0  ;;  %v570_v13 = vld [vmem:[%s756_s2] sm:$0xff]   ;;  %v604_v17 = vmov 0   ;;  %v314_v18 = vld [vmem:[%s760_s6 + $0x8] sm:$0xff]  ;;  %v316_v19 = vld [vmem:[%s760_s6 + $0x18] sm:$0xff] }
   0xc   :  { %528 = vmatpush3.bf16.msra.mxu1 %v129_v10  ;;  %522 = vmatpush3.bf16.msra.mxu0 %v75_v12  ;;  %v571_v14 = vld [vmem:[%s759_s5] sm:$0xff]   ;;  %v350_v21 = vld [vmem:[%s762_s8 + $0x8] sm:$0xff]  ;;  %vm366_vm6 = vcmask 261120   ;;  %s605_s10 = smov [#allocation3]  }
   0xd   :  { %545 = vmatprep.subr.bf16.mxu1 %v602_v2  ;;  %v313_v15 = vld [vmem:[%s760_s6] sm:$0xff]  ;;  %567 = vset.pattern.permute.xlu0 %v604_v17  ;;  %v572_v33 = vld [vmem:[%s759_s5 + $0x8] sm:$0xff]   ;;  %s479_s1 = sshll.u32 %s605_s10, 4  ;;  %s480_s1 = int_to_ptr.vmem [resolvable:$true] %s479_s1 }
   0xe   :  { %568 = vset.pattern.permute.xlu1 %v604_v17  ;;  %319 = vperm.xlu0 %567, %v313_v15   ;;  %v349_v20 = vld [vmem:[%s762_s8] sm:$0xff]  ;;  %v574_v35 = vld [vmem:[%s758_s4 + $0x8] sm:$0xff]   ;;  %s582_s22 = scalar_lea.vmem %s480_s1, 32  ;;  %p583_p1 = scmp.lt.s32.totalorder %s480_s1, %s480_s1 }
   0xf   :  { %530 = vmatmul.mubr.msk.bf16.vlgmr.msra.gmra.mrb[0].mxu1 %vm69_vm4, %v569_v11  ;;  %524 = vmatmul.mubr.msk.bf16.vlgmr.msra.gmra.mrb[0].mxu0 %vm69_vm4, %v570_v13  ;;  %v415_v22 = vld [vmem:[#allocation2] sm:$0x1] }
  0x10   :  { %549 = vmatprep.mubr.msk.bf16.mxu1 %vm603_vm0, %v602_v2  ;;  %535 = vmatprep.mubr.msk.bf16.mxu0 %vm192_vm5, %v571_v14  ;;  %v573_v34 = vld [vmem:[%s758_s4] sm:$0xff]  }
  0x11   :  { %329 = vperm.xlu1 %568, %v315_v16   ;;  %v575_v54 = vld [vmem:[%s761_s7] sm:$0xff]  }
  0x12   :  { %324 = vperm.xlu0 %567, %v314_v18   ;;  %v413_v3 = vld [vmem:[%s763_s9] sm:$0x1]  ;;  %s578_s9 = scalar_lea.vmem %s480_s1, 16 }
  0x13   :  { %p579_p0 = scmp.ne.s32.totalorder %s480_s1, %s578_s9  ;;  %p584_p2 = scmp.lt.s32.totalorder %s582_s22, %s578_s9 }
  0x15   :  { %334 = vperm.xlu1 %568, %v316_v19   ;;  %p585_p3 = por %p584_p2, %p583_p1 }
  0x16   :  { %353 = vperm.xlu0 %567, %v349_v20  }
  0x17   :  { %p586_p4 = pnand %p585_p3, %p579_p0 }
  0x19   :  { %358 = vperm.xlu1 %568, %v350_v21  }
  0x1a   :  { %418 = vperm.xlu0 %567, %v415_v22  }
  0x8d   :  { %v320_v37 = vpop.permute.xlu0 %319 }
  0x90   :  { %v330_v36 = vpop.permute.xlu1 %329 }
  0x91   :  { %v325_v44 = vpop.permute.xlu0 %324 }
  0x94   :  { %v335_v41 = vpop.permute.xlu1 %334 }
  0x95   :  { %v354_v55 = vpop.permute.xlu0 %353 }
  0x98   :  { %v359_v59 = vpop.permute.xlu1 %358 }
  0x99   :  { %v419_v5 = vpop.permute.xlu0 %418 }
  0xe2   :  { %v165_v23 = vpop.f32.mrb[0].mxu1  ;;  %v111_v24 = vpop.f32.mrb[0].mxu0 }
  0xe3   :  { %v531_v25 = vpop.f32.mrb[1].mxu1  ;;  %v525_v26 = vpop.f32.mrb[1].mxu0 }
  0xe4   :  { %v168_v27 = vpop.f32.mrb[2].mxu1  ;;  %v114_v28 = vpop.f32.mrb[2].mxu0 }
  0xe5   :  { %v181_v29 = vpack.c.bf16 %v168_v27, %v165_v23  ;;  %v532_v30 = vpop.f32.mrb[3].mxu1  ;;  %v176_v31 = vpack.c.bf16 %v114_v28, %v111_v24  ;;  %v526_v32 = vpop.f32.mrb[3].mxu0 }
  0xe7   :  { %533 = vmatprep.subr.bf16.mxu0 %v181_v29 }
  0xe8   :  { %534 = vmatpush3.bf16.msra.mxu0 %v181_v29 }
  0xe9   :  { %539 = vmatprep.subr.bf16.mxu0 %v176_v31 }
  0xeb   :  { %536 = vmatmul.mubr.msk.bf16.vlgmr.msra.gmra.mrb[4].mxu0 %vm192_vm5, %v572_v33 }
  0xec   :  { %540 = vmatpush3.bf16.msra.mxu0 %v176_v31  ;;  %541 = vmatprep.mubr.msk.bf16.mxu0 %vm192_vm5, %v573_v34 }
  0xf7   :  { %542 = vmatmul.mubr.msk.bf16.vlgmr.msra.gmra.mrb[4].mxu0 %vm192_vm5, %v574_v35 }
 0x1ca   :  { %v543_v38 = vpop.f32.mrb[4].mxu0 }
 0x1cb   :  { %v339_v39 = vadd.f32 %v543_v38, %v330_v36  ;;  %v298_v40 = vpop.f32.mrb[5].mxu0 }
 0x1cc   :  { %v337_v42 = vadd.f32 %v320_v37, %v298_v40  ;;  %v544_v43 = vpop.f32.mrb[6].mxu0 }
 0x1cd   :  { %v340_v45 = vadd.f32 %v544_v43, %v335_v41  ;;  %v301_v46 = vpop.f32.mrb[7].mxu0  ;;  %v343_v48 = vmax.f32 %v339_v39, 0.0 }
 0x1ce   :  { %v338_v47 = vadd.f32 %v325_v44, %v301_v46  ;;  %v341_v50 = vmax.f32 %v337_v42, 0.0 }
 0x1cf   :  { %v344_v49 = vmax.f32 %v340_v45, 0.0 }
 0x1d0   :  { %v342_v51 = vmax.f32 %v338_v47, 0.0 }
 0x1d1   :  { %v348_v52 = vpack.c.bf16 %v344_v49, %v343_v48 }
 0x1d2   :  { %v347_v53 = vpack.c.bf16 %v342_v51, %v341_v50 }
 0x1d4   :  { %546 = vmatpush3.bf16.msra.mxu1 %v347_v53 }
 0x1d5   :  { %547 = vmatprep.subr.bf16.mxu1 %v602_v2 }
 0x1d8   :  { %548 = vmatpush3.bf16.msra.mxu1 %v348_v52 }
 0x1d9   :  { %553 = vmatprep.subr.bf16.mxu1 %v602_v2 }
 0x1db   :  { %550 = vmatmul.mubr.msk.bf16.vlgmr.msra.gmra.mrb[4].mxu1 %vm366_vm6, %v575_v54 }
 0x1dc   :  { %555 = vmatprep.mubr.msk.bf16.mxu1 %vm603_vm0, %v602_v2  ;;  %v423_v2 = vsub.s32 0, %v675_v4 }
 0x1de   :  { %v424_v6 = vrot.slane %v419_v5, %v423_v2 }
 0x2ae   :  { %v404_v56 = vpop.f32.mrb[4].mxu1 }
 0x2af   :  { %v405_v57 = vadd.f32 %v404_v56, %v354_v55  ;;  %v551_v58 = vpop.f32.mrb[5].mxu1 }
 0x2b0   :  { %v407_v60 = vpop.f32.mrb[6].mxu1 }
 0x2b1   :  { %v408_v61 = vadd.f32 %v407_v60, %v359_v59  ;;  %v552_v62 = vpop.f32.mrb[7].mxu1  ;;  %v411_v63 = vmax.f32 %v405_v57, 0.0 }
 0x2b3   :  { %v412_v0 = vmax.f32 %v408_v61, 0.0 }
 0x2b5   :  { %v414_v1 = vpack.c.bf16 %v412_v0, %v411_v63 }
 0x2b7   :  { %554 = vmatpush3.bf16.msra.mxu1 %v414_v1 }
 0x2ba   :  { %556 = vmatmul.mubr.msk.bf16.vlgmr.msra.gmra.mrb[8].mxu1 %vm192_vm5, %v413_v3 }
 0x38d   :  { %v462_v7 = vpop.f32.mrb[8].mxu1 }
 0x38e   :  { %v463_v8 = vadd.f32 %v462_v7, %v424_v6  ;;  %v557_v9 = vpop.f32.mrb[9].mxu1 }
 0x38f   :  { %v465_v10 = vpop.f32.mrb[10].mxu1 }
 0x390   :  { %v468_v11 = vmul.f32 0.5, %v463_v8  ;;  %v558_v12 = vpop.f32.mrb[11].mxu1 }
 0x392   :  { %576 = vtanh.f32 %v468_v11 }
 0x39c   :  { %v577_v13 = vpop.eup %576 }
 0x39d   :  { %v470_v14 = vadd.f32 1.0, %v577_v13 }
 0x39f   :  { %v471_v15 = vmul.f32 0.5, %v470_v14 }
 0x3a1   :  { %472 = vst [vmem:[#allocation3] sm:$0x1] %v471_v15 }
 0x3a2   :  { %589 = shalt.err (!%p586_p4)
}
 0x3a3   :  { %s590_s24 = scalar_lea.hbm %s765_s11, 16 }
 0x3a4   :  { %p591_p5 = scmp.ne.s32.totalorder %s765_s11, %s590_s24  ;;  %p594_p6 = scmp.lt.u32.totalorder %s590_s24, %s765_s11 }
 0x3a6   :  { %p596_p7 = pnand %p594_p6, %p591_p5 }
 0x3a8   :  { %599 = shalt.err (!%p596_p7)
}
 0x3a9   :  { %482 = dma.vmem_to_hbm [thread:$0]  %s480_s1, 16, %s765_s11, [#allocation4]  }
 0x3aa   :  { %600 = dma.done.wait [#allocation4], 16  }
 0x3ab   :  { %601 = vsyncadd [#allocation4], 4294967280 }
 0x3ac   :  { %486 = vsyncpa [#allocation4], 1 }

</bundles_post_ra>
